<compile_context>
chip_gen: v5e
topology: v5e:2x2
jax: 0.10.0
libtpu: 0.0.40
codegen_flags: <defaults>
</compile_context>

<pallas_src>
from functools import partial

import jax
import jax.numpy as jnp
from jax.experimental import pallas as pl
from jax.experimental.pallas import tpu as pltpu


# ----------------------------------------------------------------------------
# Kernel
# ----------------------------------------------------------------------------
def _lsig_kernel(x_ref, slope_ref, o_ref, *, beta):
    # x_ref: (Fb, Tb) tile of one batch element; slope_ref: (Fb, 1)
    x = x_ref[...].astype(jnp.float32)
    s = slope_ref[...].astype(jnp.float32)          # broadcasts over the T lanes
    y = beta * jax.nn.sigmoid(s * x)                # EUP sigmoid + VPU mul
    o_ref[...] = y.astype(o_ref.dtype)


def _pick_tile(n, target, align):
    """Largest multiple of `align` <= target that evenly divides n, else full n."""
    if n <= target or n % align != 0:
        return n
    t = (target // align) * align
    while t >= align:
        if n % t == 0:
            return t
        t -= align
    return n


# ----------------------------------------------------------------------------
# Wrapper
# ----------------------------------------------------------------------------
def learnable_sigmoid_2d(x, slope, beta=1.0):
    """beta * sigmoid(slope * x).  x: (B, F, T) or (F, T); slope: (F,) or (F, 1)."""
    squeeze_batch = x.ndim == 2
    if squeeze_batch:
        x = x[None]
    B, F, T = x.shape
    slope = slope.reshape(F, 1).astype(x.dtype)

    # Sublane-aligned F tile, lane-aligned T tile; fall back to full dims when
    # the array is not a clean multiple (Pallas requires blocks to be multiples
    # of (8, 128) or equal to the full dims).
    Fb = _pick_tile(F, 256, 8)
    Tb = _pick_tile(T, 512, 128)
    grid = (B, F // Fb, T // Tb)

    out = pl.pallas_call(
        partial(_lsig_kernel, beta=float(beta)),
        out_shape=jax.ShapeDtypeStruct((B, F, T), x.dtype),
        grid=grid,
        in_specs=[
            pl.BlockSpec((None, Fb, Tb), lambda b, i, j: (b, i, j)),  # x tile
            pl.BlockSpec((Fb, 1), lambda b, i, j: (i, 0)),            # slope tile
        ],
        out_specs=pl.BlockSpec((None, Fb, Tb), lambda b, i, j: (b, i, j)),
        compiler_params=pltpu.CompilerParams(
            dimension_semantics=("parallel", "parallel", "parallel")),
    )(x, slope)

    return out[0] if squeeze_batch else out


# ----------------------------------------------------------------------------
if __name__ == "__main__":
    beta = 2.0
    B, F, T = 2, 64, 256                     # batch=2, in_features=64, frames=256
    key = jax.random.PRNGKey(0)
    kx, ks = jax.random.split(key)
    x = jax.random.normal(kx, (B, F, T), jnp.float32)
    # Module initializes slope to ones; perturb it so broadcasting is exercised.
    slope = 1.0 + 0.1 * jax.random.normal(ks, (F, 1), jnp.float32)

    fwd = jax.jit(partial(learnable_sigmoid_2d, beta=beta))
    y = fwd(x, slope)
    jax.block_until_ready(y)

    ref = beta * jax.nn.sigmoid(slope[None, :, :] * x)
    assert y.shape == (B, F, T)
    assert jnp.allclose(y, ref, atol=1e-5, rtol=1e-5)

    # Odd / tiny shapes (e.g. F = n_fft//2+1 = 17, T = 8) fall back to full-dim
    # blocks and still run correctly.
    x2 = jax.random.normal(kx, (B, 17, 8), jnp.float32)
    s2 = jnp.ones((17, 1), jnp.float32)
    y2 = learnable_sigmoid_2d(x2, s2, beta=beta)
    jax.block_until_ready(y2)
    assert jnp.allclose(y2, beta * jax.nn.sigmoid(s2[None] * x2),
                        atol=1e-5, rtol=1e-5)

    print("KERNEL_OK")
</pallas_src>

<mosaic_0001>
module attributes {stable_mosaic.version = 11 : i64} {
  func.func @_lsig_kernel(%arg0: i32, %arg1: i32, %arg2: i32, %arg3: memref<1x64x256xf32, #tpu.memory_space<vmem>>, %arg4: memref<64x1xf32, #tpu.memory_space<vmem>>, %arg5: memref<1x64x256xf32, #tpu.memory_space<vmem>>) attributes {dimension_semantics = [#tpu.dimension_semantics<parallel>, #tpu.dimension_semantics<parallel>, #tpu.dimension_semantics<parallel>], iteration_bounds = array<i64: 2, 1, 1>, scalar_prefetch = 0 : i64, scratch_operands = 0 : i64, tpu.core_type = #tpu.core_type<tc>, window_params = [{transform_indices = @transform_0, window_bounds = array<i64: 1, 64, 256>}, {transform_indices = @transform_1, window_bounds = array<i64: 64, 1>}, {transform_indices = @transform_2, window_bounds = array<i64: 1, 64, 256>}]} {
    %c0 = arith.constant 0 : index
    %c0_0 = arith.constant 0 : index
    %c0_1 = arith.constant 0 : index
    %0 = vector.load %arg3[%c0, %c0_0, %c0_1] : memref<1x64x256xf32, #tpu.memory_space<vmem>>, vector<1x64x256xf32>
    %1 = vector.shape_cast %0 : vector<1x64x256xf32> to vector<64x256xf32>
    %c0_2 = arith.constant 0 : index
    %c0_3 = arith.constant 0 : index
    %2 = vector.load %arg4[%c0_2, %c0_3] : memref<64x1xf32, #tpu.memory_space<vmem>>, vector<64x1xf32>
    %3 = vector.broadcast %2 : vector<64x1xf32> to vector<64x256xf32>
    %4 = arith.mulf %3, %1 : vector<64x256xf32>
    %5 = arith.negf %4 : vector<64x256xf32>
    %6 = math.exp %5 : vector<64x256xf32>
    %cst = arith.constant 1.000000e+00 : f32
    %7 = vector.broadcast %cst : f32 to vector<64x256xf32>
    %8 = arith.addf %7, %6 : vector<64x256xf32>
    %9 = arith.divf %7, %8 : vector<64x256xf32>
    %cst_4 = arith.constant 2.000000e+00 : f32
    %10 = vector.broadcast %cst_4 : f32 to vector<64x256xf32>
    %11 = arith.mulf %10, %9 : vector<64x256xf32>
    %c0_5 = arith.constant 0 : index
    %c0_6 = arith.constant 0 : index
    %c0_7 = arith.constant 0 : index
    %12 = vector.load %arg5[%c0_5, %c0_6, %c0_7] : memref<1x64x256xf32, #tpu.memory_space<vmem>>, vector<1x64x256xf32>
    %13 = vector.shape_cast %12 : vector<1x64x256xf32> to vector<64x256xf32>
    %14 = vector.shape_cast %11 : vector<64x256xf32> to vector<1x64x256xf32>
    tpu.vector_store %arg5[%c0_5, %c0_6, %c0_7], %14 {strides = array<i32>} : memref<1x64x256xf32, #tpu.memory_space<vmem>>, vector<1x64x256xf32>,
    return
  }
  func.func @transform_0(%arg0: i32, %arg1: i32, %arg2: i32) -> (i32, i32, i32) {
    %c0_i32 = arith.constant 0 : i32
    return %arg0, %arg1, %arg2 : i32, i32, i32
  }
  func.func @transform_1(%arg0: i32, %arg1: i32, %arg2: i32) -> (i32, i32) {
    %c0_i32 = arith.constant 0 : i32
    %c0_i32_0 = arith.constant 0 : i32
    return %arg1, %c0_i32 : i32, i32
  }
  func.func @transform_2(%arg0: i32, %arg1: i32, %arg2: i32) -> (i32, i32, i32) {
    %c0_i32 = arith.constant 0 : i32
    return %arg0, %arg1, %arg2 : i32, i32, i32
  }
}

</mosaic_0001>

<bundles_post_ra>
// kernel: learnable_sigmoid_2d.1
= control target key start
LH: loop header
LB: loop body
LE: loop exit
PB: predicated region body
PF: predicated region fallthrough
CT: control target
= control target key end

     0   :  { %7 = vsyncpa [#allocation3], 0  ;;  %s1433_s0 = inlined_call_operand.hbm [shape: f32[2,64,256], index: 0, kind: input, shape index: {}]   ;;  %s1434_s1 = inlined_call_operand.vmem [shape: f32[64,1], index: 1, kind: input, shape index: {}]   ;;  %s1435_s2 = inlined_call_operand.hbm [shape: f32[2,64,256], index: 2, kind: output, shape index: {}]  }
   0x1   :  { %9 = vsyncpa [#allocation3 + $0x1], 0 }
   0x2   :  { %10 = vsyncpa [#allocation4], 0 }
   0x3   :  { %12 = vsyncpa [#allocation4 + $0x1], 0  ;;  %s1070_s9 = smov 0   ;;  %s1072_s10 = smov 0  }
   0x4   :  { %s1074_s11 = smov 0   ;;  %s1076_s12 = smov 0  }
   0x5   :  { %s1078_s13 = smov 0   ;;  %s1080_s14 = smov 0  }
   0x6 LB: > { %s768_s15 = sadd.s32 4294967295, %s1048_s14   ;;  %s769_s16 = sadd.s32 4294967294, %s1048_s14   ;;  %s1048_s14 = sphi %s1080_s14, %s18_s14   ;;  %s1044_s13 = sphi %s1078_s13, %s1468_s13   ;;  %s1040_s12 = sphi %s1076_s12, %s1467_s12   ;;  %s1036_s11 = sphi %s1074_s11, %s1466_s11   ;;  %s1032_s10 = sphi %s1072_s10, %s1465_s10   ;;  %s1028_s9 = sphi %s1070_s9, %s1464_s9  }
   0x7   : > { %s37_s17 = sadd.s32 1, %s1044_s13  ;;  %s48_s18 = sadd.s32 1, %s1036_s11 }
   0x8   : > { %p39_p0 = scmp.ge.s32.totalorder %s37_s17, 2  ;;  %p55_p1 = scmp.ne.s32.totalorder %s1036_s11, %s1032_s10 }
   0x9   : > { %p56_p2 = scmp.eq.s32.totalorder %s1048_s14, 0  ;;  %p61_p3 = scmp.ne.s32.totalorder %s1032_s10, %s1028_s9 }
   0xa   : > { %s1470_s17 = smov (%p39_p0, %s37_s17), 0  ;;  %p62_p5 = scmp.eq.s32.totalorder %s768_s15, 0 }
   0xb   : > { %p1111_p4 = por %p56_p2, %p55_p1  ;;  %s41_s20 = ssub.s32 %s1044_s13, %s1470_s17 }
   0xc   : > { %p115_p6 = scmp.eq.s32.totalorder %s768_s15, 1  ;;  %p46_p7 = scmp.eq.s32.totalorder %s41_s20, 0 }
   0xd   : > { %p1117_p8 = por %p62_p5, %p61_p3  ;;  %p121_p10 = scmp.eq.s32.totalorder %s769_s16, 1 }
   0xe   : > { %p1121_p9 = por %p115_p6, %p55_p1  ;;  %p772_p12 = scmp.ge.s32.totalorder %s1048_s14, 2 }
   0xf   : > { %s1126_s23 = scalar_select %p46_p7, %s1036_s11, %s48_s18  }
  0x10   : > { %p1128_p11 = por %p121_p10, %p61_p3  ;;  %p814_p13 = scmp.lt.s32.totalorder %s1048_s14, 2 }
  0x11   : > { %s150_s25 = sand.u32 1, %s1036_s11   ;;  %s800_s27 = sshll.u32 %s1044_s13, 7 }
  0x12   : > { %s773_s26 = sshll.u32 %s150_s25, 7  ;;  %s164_s30 = scalar_lea.hbm %s1433_s0, %s800_s27 }
  0x13   : > { %s154_s3 = scalar_lea.vmem [#allocation2], %s773_s26  ;;  %s165_s5 = sshll.u32 %s164_s30, 4  ;;  %s166_s5 = int_to_ptr.hbm [resolvable:$true] %s165_s5 }
  0x14   : > { %s167_s4 = sshll.u32 %s154_s3, 4  ;;  %p807_p0 = pnand %p814_p13, %p1111_p4  ;;  %s168_s4 = int_to_ptr.vmem [resolvable:$true] %s167_s4 }
  0x15   : > { %p776_p1 = scmp.ge.s32.totalorder %s1048_s14, 1  ;;  %s151_s6 = scalar_lea.sflag [#allocation3], %s150_s25 }
  0x16   : > { %s1050_s7 = smov 256   ;;  %s1051_s8 = smov 16  }
  0x17   : > { %809 = dma.hbm_to_vmem [thread:$0]  (!%p807_p0), %s166_s5, 2048, %s168_s4, %s151_s6, %s1050_s7, %s1050_s7, %s1051_s8  }
  0x18   : > { %p175_p2 = scmp.lt.s32.totalorder %s1048_s14, 3 }
  0x1a   : > { %p176_p3 = pnand %p776_p1, %p175_p2 }
  0x1b   : > { %s1144_s15 = sand.u32 (!%p176_p3), 1, %s1032_s10  }
  0x1c   : > { %179 = sbr.rel (%p176_p3) target bundleno = 226 (0xe2), region = 28  ;;  %s777_s16 = sshll.u32 (!%p176_p3), %s1144_s15, 7 }
  0x1d   : > { %s182_s18 = scalar_lea.sflag (!%p176_p3), [#allocation3], %s1144_s15  ;;  %s1150_s19 = scalar_lea.vmem (!%p176_p3), [#allocation2], %s777_s16 }
  0x21   : > { %1019 = dma.done.wait (%p1117_p8), %s182_s18, 2048  }
  0x22   : > { %1021 = vsyncadd (%p1117_p8), %s182_s18, 4294965248  ;;  %v1052_v0 = vmov 0   ;;  %v240_v1 = vld [vmem:[%s1434_s1 + $0x10] sm:$0xff]  ;;  %v238_v2 = vld [vmem:[%s1434_s1] sm:$0xff]  ;;  %s1229_s25 = scalar_lea.vmem [#allocation5], %s777_s16  ;;  %s801_s16 = sshll.u32 %s1040_s12, 7 }
  0x23   : > { %870 = vset.pattern.permute.xlu1 %v1052_v0  ;;  %869 = vset.pattern.permute.xlu0 %v1052_v0  ;;  %v242_v3 = vld [vmem:[%s1434_s1 + $0x20] sm:$0xff]  ;;  %v241_v4 = vld [vmem:[%s1434_s1 + $0x18] sm:$0xff]  ;;  %v239_v5 = vld [vmem:[%s1434_s1 + $0x8] sm:$0xff]  ;;  %s655_s26 = scalar_lea.hbm %s1435_s2, %s801_s16  ;;  %s656_s27 = sshll.u32 %s1229_s25, 4  ;;  %s657_s27 = int_to_ptr.vmem [resolvable:$true] %s656_s27 }
  0x24   : > { %871 = vset.pattern.permute.xlu2 %v1052_v0  ;;  %258 = vperm.xlu1 %870, %v240_v1   ;;  %v243_v6 = vld [vmem:[%s1434_s1 + $0x28] sm:$0xff]  ;;  %v245_v7 = vld [vmem:[%s1434_s1 + $0x38] sm:$0xff]  ;;  %v244_v8 = vld [vmem:[%s1434_s1 + $0x30] sm:$0xff]  ;;  %s658_s28 = sshll.u32 %s655_s26, 4  ;;  %s639_s29 = scalar_lea.sflag [#allocation4], %s1144_s15  ;;  %s659_s28 = int_to_ptr.hbm [resolvable:$true] %s658_s28 }
  0x25   : > { %248 = vperm.xlu0 %869, %v238_v2   ;;  %268 = vperm.xlu2 %871, %v242_v3   ;;  %v230_v9 = vld [vmem:[%s1150_s19 + $0x40] sm:$0xff]  ;;  %v231_v10 = vld [vmem:[%s1150_s19 + $0x48] sm:$0xff]  ;;  %v232_v16 = vld [vmem:[%s1150_s19 + $0x50] sm:$0xff]  ;;  %s980_s21 = sshra.s32 %s659_s28, 4  ;;  %s986_s5 = scalar_lea.hbm %s1435_s2, 256  ;;  %s981_s21 = int_to_ptr.hbm [resolvable:$true] %s980_s21 }
  0x26   : > { %v233_v17 = vld [vmem:[%s1150_s19 + $0x58] sm:$0xff]  ;;  %v226_v34 = vld [vmem:[%s1150_s19 + $0x20] sm:$0xff]  ;;  %v227_v35 = vld [vmem:[%s1150_s19 + $0x28] sm:$0xff]  ;;  %s982_s30 = scalar_lea.hbm %s981_s21, 128  ;;  %p987_p7 = scmp.lt.s32.totalorder %s981_s21, %s1435_s2 }
  0x27   : > { %v222_v36 = vld [vmem:[%s1150_s19] sm:$0xff]  ;;  %v223_v48 = vld [vmem:[%s1150_s19 + $0x8] sm:$0xff]  ;;  %p983_p4 = scmp.ne.s32.totalorder %s981_s21, %s982_s30  ;;  %p988_p8 = scmp.lt.s32.totalorder %s986_s5, %s982_s30 }
  0x29   : > { %p984_p5 = pnand %p983_p4, %p1121_p9  ;;  %p989_p10 = por %p988_p8, %p987_p7 }
  0x2b   : > { %p985_p6 = pneg %p984_p5 }
  0x2c   : > { %263 = vperm.xlu1 %870, %v241_v4  }
  0x2d   : > { %253 = vperm.xlu0 %869, %v239_v5   ;;  %273 = vperm.xlu2 %871, %v243_v6   ;;  %p990_p13 = pnand %p989_p10, %p985_p6 }
  0x34   : > { %283 = vperm.xlu1 %870, %v245_v7  }
  0x35   : > { %278 = vperm.xlu0 %869, %v244_v8   ;;  %v228_v8 = vld [vmem:[%s1150_s19 + $0x30] sm:$0xff] }
  0x7f   : > { %v269_v11 = vpop.permute.xlu2 %268 }
  0x80   : > { %v294_v12 = vmul.f32 %v269_v11, %v230_v9  ;;  %v295_v13 = vmul.f32 %v269_v11, %v231_v10 }
  0x82   : > { %v787_v14 = vmul.f32 -1.442695, %v294_v12  ;;  %v788_v15 = vmul.f32 -1.442695, %v295_v13 }
  0x84   : > { %872 = vpow2.f32 %v787_v14 }
  0x85   : > { %874 = vpow2.f32 %v788_v15 }
  0x87   : > { %v274_v18 = vpop.permute.xlu2 %273 }
  0x88   : > { %v296_v19 = vmul.f32 %v274_v18, %v232_v16  ;;  %v297_v20 = vmul.f32 %v274_v18, %v233_v17 }
  0x8a   : > { %v873_v21 = vpop.eup %872  ;;  %v789_v22 = vmul.f32 -1.442695, %v296_v19  ;;  %v790_v25 = vmul.f32 -1.442695, %v297_v20 }
  0x8b   : > { %v875_v23 = vpop.eup %874  ;;  %v358_v24 = vadd.f32 1.0, %v873_v21 }
  0x8c   : > { %v359_v26 = vadd.f32 1.0, %v875_v23  ;;  %876 = vpow2.f32 %v789_v22 }
  0x8d   : > { %878 = vrcp.f32 %v358_v24  ;;  %vm491_vm0 = vweird.f32 %v358_v24  ;;  %v495_v32 = vand.u32 2147483647, %v358_v24  ;;  %v497_v33 = vand.u32 2147483648, %v358_v24 }
  0x8e   : > { %880 = vrcp.f32 %v359_v26  ;;  %vm506_vm1 = vweird.f32 %v359_v26  ;;  %v510_v39 = vand.u32 2147483647, %v359_v26  ;;  %v512_v40 = vand.u32 2147483648, %v359_v26 }
  0x8f   : > { %882 = vpow2.f32 %v790_v25  ;;  %vm1193_vm4 = vcmp.eq.f32.partialorder %v495_v32, 8.507059e+37  ;;  %v498_v53 = vor.u32 1.1754944e-38, %v497_v33 }
  0x90   : > { %vm1203_vm6 = vcmp.eq.f32.partialorder %v510_v39, 8.507059e+37  ;;  %v513_v56 = vor.u32 1.1754944e-38, %v512_v40 }
  0x92   : > { %v877_v27 = vpop.eup %876 }
  0x93   : > { %v879_v28 = vpop.eup %878  ;;  %v1184_v29 = vadd.f32 1.0, %v877_v27 }
  0x94   : > { %v881_v30 = vpop.eup %880  ;;  %v487_v31 = vmul.f32 %v879_v28, %v358_v24  ;;  %vm492_vm2 = vweird.f32 %v879_v28 }
  0x95   : > { %v883_v37 = vpop.eup %882  ;;  %v502_v38 = vmul.f32 %v881_v30, %v359_v26  ;;  %884 = vrcp.f32 %v1184_v29  ;;  %vm507_vm3 = vweird.f32 %v881_v30  ;;  %vm1199_vm5 = vmor %vm491_vm0, %vm492_vm2  ;;  %vm521_vm8 = vweird.f32 %v1184_v29 }
  0x96   : > { %v488_v41 = vsub.f32 1.0, %v487_v31  ;;  %v1190_v42 = vadd.f32 1.0, %v883_v37  ;;  %v259_v43 = vpop.permute.xlu1 %258  ;;  %vm1209_vm7 = vmor %vm506_vm1, %vm507_vm3  ;;  %v527_v0 = vand.u32 2147483648, %v1184_v29  ;;  %v525_v4 = vand.u32 2147483647, %v1184_v29  ;;  %v224_v31 = vld [vmem:[%s1150_s19 + $0x10] sm:$0xff] }
  0x97   : > { %v249_v44 = vpop.permute.xlu0 %248  ;;  %v503_v45 = vsub.f32 1.0, %v502_v38  ;;  %v290_v46 = vmul.f32 %v259_v43, %v226_v34  ;;  %v291_v47 = vmul.f32 %v259_v43, %v227_v35 }
  0x98   : > { %v286_v49 = vmul.f32 %v249_v44, %v222_v36  ;;  %v489_v50 = vmul.f32 %v879_v28, %v488_v41  ;;  %886 = vrcp.f32 %v1190_v42  ;;  %v287_v61 = vmul.f32 %v249_v44, %v223_v48  ;;  %v225_v36 = vld [vmem:[%s1150_s19 + $0x18] sm:$0xff] }
  0x99   : > { %v504_v54 = vmul.f32 %v881_v30, %v503_v45  ;;  %v783_v59 = vmul.f32 -1.442695, %v290_v46  ;;  %v784_v60 = vmul.f32 -1.442695, %v291_v47  ;;  %v528_v15 = vor.u32 1.1754944e-38, %v527_v0 }
  0x9a   : > { %v490_v57 = vadd.f32 %v879_v28, %v489_v50  ;;  %v779_v1 = vmul.f32 -1.442695, %v286_v49  ;;  %v780_v7 = vmul.f32 -1.442695, %v287_v61  ;;  %v542_v18 = vand.u32 2147483648, %v1190_v42 }
  0x9b   : > { %v885_v62 = vpop.eup %884  ;;  %v505_v63 = vadd.f32 %v881_v30, %v504_v54  ;;  %888 = vpow2.f32 %v783_v59  ;;  %vm536_vm11 = vweird.f32 %v1190_v42  ;;  %v540_v22 = vand.u32 2147483647, %v1190_v42 }
  0x9c   : > { %v494_v2 = vsel %vm1199_vm5, %v879_v28, %v490_v57  ;;  %v517_v3 = vmul.f32 %v885_v62, %v1184_v29  ;;  %890 = vpow2.f32 %v784_v60  ;;  %vm522_vm9 = vweird.f32 %v885_v62  ;;  %v229_v29 = vld [vmem:[%s1150_s19 + $0x38] sm:$0xff] }
  0x9d   : > { %v499_v5 = vsel %vm1193_vm4, %v498_v53, %v494_v2  ;;  %v509_v6 = vsel %vm1209_vm7, %v881_v30, %v505_v63  ;;  %892 = vpow2.f32 %v779_v1  ;;  %vm1236_vm10 = vmor %vm521_vm8, %vm522_vm9  ;;  %vm526_vm13 = vcmp.eq.f32.partialorder %v525_v4, 8.507059e+37 }
  0x9e   : > { %v887_v9 = vpop.eup %886  ;;  %v514_v10 = vsel %vm1203_vm6, %v513_v56, %v509_v6  ;;  %v614_v11 = vmul.f32 2.0, %v499_v5  ;;  %v518_v12 = vsub.f32 1.0, %v517_v3  ;;  %v264_v13 = vpop.permute.xlu1 %263  ;;  %894 = vpow2.f32 %v780_v7 }
  0x9f   : > { %v615_v14 = vmul.f32 2.0, %v514_v10  ;;  %v532_v16 = vmul.f32 %v887_v9, %v1190_v42  ;;  %v292_v19 = vmul.f32 %v264_v13, %v228_v8  ;;  %vm537_vm12 = vweird.f32 %v887_v9  ;;  %v254_v30 = vpop.permute.xlu0 %253 }
  0xa0   : > { %630 = vst [vmem:[%s1229_s25 + $0x40] sm:$0xff] %v614_v11  ;;  %v519_v17 = vmul.f32 %v885_v62, %v518_v12  ;;  %vm1248_vm14 = vmor %vm536_vm11, %vm537_vm12  ;;  %v543_v34 = vor.u32 1.1754944e-38, %v542_v18  ;;  %vm541_vm15 = vcmp.eq.f32.partialorder %v540_v22, 8.507059e+37  ;;  %v293_v42 = vmul.f32 %v264_v13, %v229_v29  ;;  %v236_v12 = vld [vmem:[%s1150_s19 + $0x70] sm:$0xff] }
  0xa1   : > { %631 = vst [vmem:[%s1229_s25 + $0x48] sm:$0xff] %v615_v14  ;;  %v533_v21 = vsub.f32 1.0, %v532_v16  ;;  %v889_v23 = vpop.eup %888  ;;  %v785_v25 = vmul.f32 -1.442695, %v292_v19  ;;  %v288_v43 = vmul.f32 %v254_v30, %v224_v31  ;;  %v289_v45 = vmul.f32 %v254_v30, %v225_v36 }
  0xa2   : > { %v520_v24 = vadd.f32 %v885_v62, %v519_v17  ;;  %v891_v26 = vpop.eup %890  ;;  %v1242_v28 = vadd.f32 1.0, %v889_v23  ;;  %v786_v54 = vmul.f32 -1.442695, %v293_v42 }
  0xa3   : > { %v534_v27 = vmul.f32 %v887_v9, %v533_v21  ;;  %v1252_v35 = vadd.f32 1.0, %v891_v26  ;;  %896 = vpow2.f32 %v785_v25  ;;  %v893_v37 = vpop.eup %892  ;;  %v781_v55 = vmul.f32 -1.442695, %v288_v43 }
  0xa4   : > { %v524_v32 = vsel %vm1236_vm10, %v885_v62, %v520_v24  ;;  %898 = vrcp.f32 %v1242_v28  ;;  %v895_v40 = vpop.eup %894  ;;  %v435_v47 = vand.u32 2147483647, %v1242_v28  ;;  %v437_v48 = vand.u32 2147483648, %v1242_v28 }
  0xa5   : > { %v529_v38 = vsel %vm526_vm13, %v528_v15, %v524_v32  ;;  %v535_v39 = vadd.f32 %v887_v9, %v534_v27  ;;  %900 = vrcp.f32 %v1252_v35  ;;  %v1262_v49 = vadd.f32 1.0, %v893_v37  ;;  %v237_v32 = vld [vmem:[%s1150_s19 + $0x78] sm:$0xff] }
  0xa6   : > { %v616_v41 = vmul.f32 2.0, %v529_v38  ;;  %v450_v51 = vand.u32 2147483647, %v1252_v35  ;;  %v1265_v52 = vadd.f32 1.0, %v895_v40  ;;  %vm431_vm0 = vweird.f32 %v1242_v28  ;;  %v284_v11 = vpop.permute.xlu1 %283 }
  0xa7   : > { %v539_v44 = vsel %vm1248_vm14, %v887_v9, %v535_v39  ;;  %902 = vrcp.f32 %v1262_v49  ;;  %v452_v57 = vand.u32 2147483648, %v1252_v35  ;;  %v782_v58 = vmul.f32 -1.442695, %v289_v45 }
  0xa8   : > { %v544_v46 = vsel %vm541_vm15, %v543_v34, %v539_v44  ;;  %632 = vst [vmem:[%s1229_s25 + $0x50] sm:$0xff] %v616_v41  ;;  %904 = vrcp.f32 %v1265_v52  ;;  %vm1273_vm1 = vcmp.eq.f32.partialorder %v435_v47, 8.507059e+37  ;;  %v438_v62 = vor.u32 1.1754944e-38, %v437_v48 }
  0xa9   : > { %v617_v50 = vmul.f32 2.0, %v544_v46  ;;  %v897_v53 = vpop.eup %896  ;;  %vm446_vm2 = vweird.f32 %v1252_v35  ;;  %vm1279_vm3 = vcmp.eq.f32.partialorder %v450_v51, 8.507059e+37  ;;  %v375_v1 = vand.u32 2147483647, %v1262_v49 }
  0xaa   : > { %v899_v56 = vpop.eup %898  ;;  %v377_v2 = vand.u32 2147483648, %v1262_v49  ;;  %v390_v4 = vand.u32 2147483647, %v1265_v52  ;;  %906 = vpow2.f32 %v786_v54  ;;  %v1286_v5 = vadd.f32 1.0, %v897_v53 }
  0xab   : > { %633 = vst [vmem:[%s1229_s25 + $0x58] sm:$0xff] %v617_v50  ;;  %v901_v59 = vpop.eup %900  ;;  %v427_v60 = vmul.f32 %v899_v56, %v1242_v28  ;;  %v453_v7 = vor.u32 1.1754944e-38, %v452_v57  ;;  %vm371_vm4 = vweird.f32 %v1262_v49  ;;  %908 = vpow2.f32 %v781_v55  ;;  %v234_v57 = vld [vmem:[%s1150_s19 + $0x60] sm:$0xff] }
  0xac   : > { %v442_v63 = vmul.f32 %v901_v59, %v1252_v35  ;;  %vm432_vm5 = vweird.f32 %v899_v56  ;;  %vm386_vm6 = vweird.f32 %v1265_v52  ;;  %v392_v10 = vand.u32 2147483648, %v1265_v52 }
  0xad   : > { %v428_v3 = vsub.f32 1.0, %v427_v60  ;;  %v903_v8 = vpop.eup %902  ;;  %910 = vrcp.f32 %v1286_v5  ;;  %vm447_vm7 = vweird.f32 %v901_v59  ;;  %vm1294_vm8 = vcmp.eq.f32.partialorder %v375_v1, 8.507059e+37  ;;  %vm433_vm10 = vmor %vm431_vm0, %vm432_vm5  ;;  %v235_v1 = vld [vmem:[%s1150_s19 + $0x68] sm:$0xff] }
  0xae   : > { %v443_v6 = vsub.f32 1.0, %v442_v63  ;;  %v905_v13 = vpop.eup %904  ;;  %v367_v15 = vmul.f32 %v903_v8, %v1262_v49  ;;  %v378_v18 = vor.u32 1.1754944e-38, %v377_v2  ;;  %vm1299_vm9 = vcmp.eq.f32.partialorder %v390_v4, 8.507059e+37  ;;  %vm448_vm11 = vmor %vm446_vm2, %vm447_vm7 }
  0xaf   : > { %v429_v9 = vmul.f32 %v899_v56, %v428_v3  ;;  %v382_v19 = vmul.f32 %v905_v13, %v1265_v52  ;;  %912 = vpow2.f32 %v782_v58  ;;  %v300_v23 = vmul.f32 %v284_v11, %v236_v12 }
  0xb0   : > { %v444_v14 = vmul.f32 %v901_v59, %v443_v6  ;;  %v368_v22 = vsub.f32 1.0, %v367_v15  ;;  %v907_v24 = vpop.eup %906  ;;  %vm372_vm12 = vweird.f32 %v903_v8  ;;  %vm387_vm13 = vweird.f32 %v905_v13 }
  0xb1   : > { %v430_v17 = vadd.f32 %v899_v56, %v429_v9  ;;  %v383_v26 = vsub.f32 1.0, %v382_v19  ;;  %v909_v27 = vpop.eup %908  ;;  %v1310_v31 = vadd.f32 1.0, %v907_v24  ;;  %v393_v40 = vor.u32 1.1754944e-38, %v392_v10  ;;  %vm373_vm14 = vmor %vm371_vm4, %vm372_vm12 }
  0xb2   : > { %v445_v21 = vadd.f32 %v901_v59, %v444_v14  ;;  %v369_v30 = vmul.f32 %v903_v8, %v368_v22  ;;  %v1315_v37 = vadd.f32 1.0, %v909_v27  ;;  %v465_v43 = vand.u32 2147483647, %v1286_v5  ;;  %vm388_vm15 = vmor %vm386_vm6, %vm387_vm13 }
  0xb3   : > { %v434_v25 = vsel %vm433_vm10, %v899_v56, %v430_v17  ;;  %v911_v33 = vpop.eup %910  ;;  %v384_v36 = vmul.f32 %v905_v13, %v383_v26  ;;  %914 = vrcp.f32 %v1310_v31  ;;  %v301_v44 = vmul.f32 %v284_v11, %v237_v32  ;;  %v279_v56 = vpop.permute.xlu0 %278 }
  0xb4   : > { %v439_v29 = vsel %vm1273_vm1, %v438_v62, %v434_v25  ;;  %v449_v28 = vsel %vm448_vm11, %v901_v59, %v445_v21  ;;  %v370_v39 = vadd.f32 %v903_v8, %v369_v30  ;;  %v457_v41 = vmul.f32 %v911_v33, %v1286_v5 }
  0xb5   : > { %v454_v34 = vsel %vm1279_vm3, %v453_v7, %v449_v28  ;;  %v610_v35 = vmul.f32 2.0, %v439_v29  ;;  %v385_v42 = vadd.f32 %v905_v13, %v384_v36  ;;  %v913_v45 = vpop.eup %912  ;;  %v467_v48 = vand.u32 2147483648, %v1286_v5 }
  0xb6   : > { %v611_v38 = vmul.f32 2.0, %v454_v34  ;;  %v374_v46 = vsel %vm373_vm14, %v903_v8, %v370_v39  ;;  %v458_v47 = vsub.f32 1.0, %v457_v41  ;;  %916 = vrcp.f32 %v1315_v37 }
  0xb7   : > { %626 = vst [vmem:[%s1229_s25 + $0x20] sm:$0xff] %v610_v35  ;;  %v379_v49 = vsel %vm1294_vm8, %v378_v18, %v374_v46  ;;  %v389_v50 = vsel %vm388_vm15, %v905_v13, %v385_v42  ;;  %v1332_v51 = vadd.f32 1.0, %v913_v45  ;;  %v793_v53 = vmul.f32 -1.442695, %v300_v23 }
  0xb8   : > { %627 = vst [vmem:[%s1229_s25 + $0x28] sm:$0xff] %v611_v38  ;;  %v394_v54 = vsel %vm1299_vm9, %v393_v40, %v389_v50  ;;  %v606_v55 = vmul.f32 2.0, %v379_v49  ;;  %v459_v52 = vmul.f32 %v911_v33, %v458_v47  ;;  %vm462_vm0 = vweird.f32 %v911_v33 }
  0xb9   : > { %v607_v58 = vmul.f32 2.0, %v394_v54  ;;  %v480_v59 = vand.u32 2147483647, %v1310_v31  ;;  %v482_v60 = vand.u32 2147483648, %v1310_v31  ;;  %vm461_vm1 = vweird.f32 %v1286_v5  ;;  %v915_v63 = vpop.eup %914 }
  0xba   : > { %622 = vst [vmem:[%s1229_s25] sm:$0xff] %v606_v55  ;;  %v460_v61 = vadd.f32 %v911_v33, %v459_v52  ;;  %918 = vrcp.f32 %v1332_v51  ;;  %v794_v62 = vmul.f32 -1.442695, %v301_v44  ;;  %vm463_vm2 = vmor %vm461_vm1, %vm462_vm0  ;;  %v468_v0 = vor.u32 1.1754944e-38, %v467_v48 }
  0xbb   : > { %623 = vst [vmem:[%s1229_s25 + $0x8] sm:$0xff] %v607_v58  ;;  %920 = vpow2.f32 %v793_v53  ;;  %v298_v2 = vmul.f32 %v279_v56, %v234_v57  ;;  %vm466_vm3 = vcmp.eq.f32.partialorder %v465_v43, 8.507059e+37  ;;  %v472_v6 = vmul.f32 %v915_v63, %v1310_v31 }
  0xbc   : > { %v917_v3 = vpop.eup %916  ;;  %v464_v4 = vsel %vm463_vm2, %v911_v33, %v460_v61  ;;  %vm476_vm4 = vweird.f32 %v1310_v31  ;;  %vm1346_vm5 = vcmp.eq.f32.partialorder %v480_v59, 8.507059e+37  ;;  %v483_v8 = vor.u32 1.1754944e-38, %v482_v60 }
  0xbd   : > { %v469_v7 = vsel %vm466_vm3, %v468_v0, %v464_v4  ;;  %v397_v9 = vmul.f32 %v917_v3, %v1315_v37  ;;  %v473_v10 = vsub.f32 1.0, %v472_v6  ;;  %922 = vpow2.f32 %v794_v62 }
  0xbe   : > { %v612_v11 = vmul.f32 2.0, %v469_v7  ;;  %v299_v12 = vmul.f32 %v279_v56, %v235_v1  ;;  %v405_v14 = vand.u32 2147483647, %v1315_v37  ;;  %v407_v15 = vand.u32 2147483648, %v1315_v37 }
  0xbf   : > { %v398_v13 = vsub.f32 1.0, %v397_v9  ;;  %v791_v16 = vmul.f32 -1.442695, %v298_v2  ;;  %v474_v18 = vmul.f32 %v915_v63, %v473_v10  ;;  %vm477_vm6 = vweird.f32 %v915_v63 }
  0xc0   : > { %v919_v17 = vpop.eup %918  ;;  %628 = vst [vmem:[%s1229_s25 + $0x30] sm:$0xff] %v612_v11  ;;  %vm401_vm7 = vweird.f32 %v1315_v37  ;;  %v792_v19 = vmul.f32 -1.442695, %v299_v12  ;;  %vm402_vm8 = vweird.f32 %v917_v3  ;;  %v420_v24 = vand.u32 2147483647, %v1332_v51  ;;  %vm478_vm9 = vmor %vm476_vm4, %vm477_vm6 }
  0xc1   : > { %v921_v20 = vpop.eup %920  ;;  %v399_v21 = vmul.f32 %v917_v3, %v398_v13  ;;  %v412_v22 = vmul.f32 %v919_v17, %v1332_v51  ;;  %924 = vpow2.f32 %v791_v16  ;;  %v475_v23 = vadd.f32 %v915_v63, %v474_v18  ;;  %vm403_vm11 = vmor %vm401_vm7, %vm402_vm8 }
  0xc2   : > { %v364_v25 = vadd.f32 1.0, %v921_v20  ;;  %926 = vpow2.f32 %v792_v19  ;;  %vm406_vm10 = vcmp.eq.f32.partialorder %v405_v14, 8.507059e+37  ;;  %v408_v27 = vor.u32 1.1754944e-38, %v407_v15 }
  0xc3   : > { %v400_v26 = vadd.f32 %v917_v3, %v399_v21  ;;  %v413_v29 = vsub.f32 1.0, %v412_v22  ;;  %v923_v28 = vpop.eup %922  ;;  %v479_v30 = vsel %vm478_vm9, %v915_v63, %v475_v23  ;;  %vm417_vm12 = vweird.f32 %v919_v17 }
  0xc4   : > { %v422_v32 = vand.u32 2147483648, %v1332_v51  ;;  %928 = vrcp.f32 %v364_v25  ;;  %v484_v33 = vsel %vm1346_vm5, %v483_v8, %v479_v30  ;;  %v365_v35 = vadd.f32 1.0, %v923_v28 }
  0xc5   : > { %v404_v34 = vsel %vm403_vm11, %v917_v3, %v400_v26  ;;  %v414_v31 = vmul.f32 %v919_v17, %v413_v29  ;;  %v613_v36 = vmul.f32 2.0, %v484_v33  ;;  %vm416_vm13 = vweird.f32 %v1332_v51 }
  0xc6   : > { %v409_v38 = vsel %vm406_vm10, %v408_v27, %v404_v34  ;;  %930 = vrcp.f32 %v365_v35  ;;  %vm418_vm14 = vmor %vm416_vm13, %vm417_vm12  ;;  %v423_v42 = vor.u32 1.1754944e-38, %v422_v32  ;;  %vm421_vm15 = vcmp.eq.f32.partialorder %v420_v24, 8.507059e+37 }
  0xc7   : > { %v925_v39 = vpop.eup %924  ;;  %v415_v40 = vadd.f32 %v919_v17, %v414_v31  ;;  %v608_v37 = vmul.f32 2.0, %v409_v38  ;;  %629 = vst [vmem:[%s1229_s25 + $0x38] sm:$0xff] %v613_v36  ;;  %v585_v53 = vand.u32 2147483647, %v364_v25  ;;  %v587_v54 = vand.u32 2147483648, %v364_v25 }
  0xc8   : > { %v927_v41 = vpop.eup %926  ;;  %v1367_v43 = vadd.f32 1.0, %v925_v39  ;;  %v600_v52 = vand.u32 2147483647, %v365_v35  ;;  %v602_v57 = vand.u32 2147483648, %v365_v35  ;;  %vm581_vm1 = vweird.f32 %v364_v25 }
  0xc9   : > { %v419_v44 = vsel %vm418_vm14, %v919_v17, %v415_v40  ;;  %624 = vst [vmem:[%s1229_s25 + $0x10] sm:$0xff] %v608_v37  ;;  %v1370_v45 = vadd.f32 1.0, %v927_v41  ;;  %vm586_vm2 = vcmp.eq.f32.partialorder %v585_v53, 8.507059e+37  ;;  %vm596_vm3 = vweird.f32 %v365_v35 }
  0xca   : > { %v929_v46 = vpop.eup %928  ;;  %v424_v47 = vsel %vm421_vm15, %v423_v42, %v419_v44  ;;  %932 = vrcp.f32 %v1367_v43  ;;  %v588_v63 = vor.u32 1.1754944e-38, %v587_v54  ;;  %vm1376_vm6 = vcmp.eq.f32.partialorder %v600_v52, 8.507059e+37 }
  0xcb   : > { %v609_v48 = vmul.f32 2.0, %v424_v47  ;;  %v577_v49 = vmul.f32 %v929_v46, %v364_v25  ;;  %934 = vrcp.f32 %v1370_v45  ;;  %vm582_vm0 = vweird.f32 %v929_v46 }
  0xcc   : > { %v931_v50 = vpop.eup %930  ;;  %vm583_vm4 = vmor %vm581_vm1, %vm582_vm0  ;;  %v603_v3 = vor.u32 1.1754944e-38, %v602_v57  ;;  %v555_v8 = vand.u32 2147483647, %v1367_v43  ;;  %v557_v9 = vand.u32 2147483648, %v1367_v43  ;;  %vm551_vm9 = vweird.f32 %v1367_v43 }
  0xcd   : > { %625 = vst [vmem:[%s1229_s25 + $0x18] sm:$0xff] %v609_v48  ;;  %v578_v51 = vsub.f32 1.0, %v577_v49  ;;  %v592_v55 = vmul.f32 %v931_v50, %v365_v35  ;;  %vm597_vm5 = vweird.f32 %v931_v50  ;;  %v570_v14 = vand.u32 2147483647, %v1370_v45 }
  0xce   : > { %vm598_vm7 = vmor %vm596_vm3, %vm597_vm5  ;;  %v572_v15 = vand.u32 2147483648, %v1370_v45  ;;  %v558_v20 = vor.u32 1.1754944e-38, %v557_v9  ;;  %vm556_vm12 = vcmp.eq.f32.partialorder %v555_v8, 8.507059e+37  ;;  %vm566_vm13 = vweird.f32 %v1370_v45 }
  0xcf   : > { %v579_v56 = vmul.f32 %v929_v46, %v578_v51  ;;  %v593_v59 = vsub.f32 1.0, %v592_v55  ;;  %vm571_vm15 = vcmp.eq.f32.partialorder %v570_v14, 8.507059e+37 }
  0xd0   : > { %v933_v58 = vpop.eup %932  ;;  %v573_v24 = vor.u32 1.1754944e-38, %v572_v15 }
  0xd1   : > { %v580_v60 = vadd.f32 %v929_v46, %v579_v56  ;;  %v547_v61 = vmul.f32 %v933_v58, %v1367_v43  ;;  %v935_v62 = vpop.eup %934  ;;  %v594_v0 = vmul.f32 %v931_v50, %v593_v59  ;;  %vm552_vm8 = vweird.f32 %v933_v58 }
  0xd2   : > { %v562_v6 = vmul.f32 %v935_v62, %v1370_v45  ;;  %vm567_vm10 = vweird.f32 %v935_v62  ;;  %vm553_vm11 = vmor %vm551_vm9, %vm552_vm8 }
  0xd3   : > { %v584_v2 = vsel %vm583_vm4, %v929_v46, %v580_v60  ;;  %v548_v4 = vsub.f32 1.0, %v547_v61  ;;  %v595_v5 = vadd.f32 %v931_v50, %v594_v0  ;;  %vm568_vm14 = vmor %vm566_vm13, %vm567_vm10 }
  0xd4   : > { %v589_v7 = vsel %vm586_vm2, %v588_v63, %v584_v2  ;;  %v563_v12 = vsub.f32 1.0, %v562_v6 }
  0xd5   : > { %v620_v10 = vmul.f32 2.0, %v589_v7  ;;  %v549_v11 = vmul.f32 %v933_v58, %v548_v4  ;;  %v599_v13 = vsel %vm598_vm7, %v931_v50, %v595_v5 }
  0xd6   : > { %v604_v16 = vsel %vm1376_vm6, %v603_v3, %v599_v13  ;;  %v564_v18 = vmul.f32 %v935_v62, %v563_v12 }
  0xd7   : > { %636 = vst [vmem:[%s1229_s25 + $0x70] sm:$0xff] %v620_v10  ;;  %v550_v17 = vadd.f32 %v933_v58, %v549_v11  ;;  %v621_v19 = vmul.f32 2.0, %v604_v16 }
  0xd8   : > { %v565_v22 = vadd.f32 %v935_v62, %v564_v18 }
  0xd9   : > { %v554_v21 = vsel %vm553_vm11, %v933_v58, %v550_v17  ;;  %637 = vst [vmem:[%s1229_s25 + $0x78] sm:$0xff] %v621_v19 }
  0xda   : > { %v559_v23 = vsel %vm556_vm12, %v558_v20, %v554_v21  ;;  %v569_v25 = vsel %vm568_vm14, %v935_v62, %v565_v22 }
  0xdb   : > { %v618_v26 = vmul.f32 2.0, %v559_v23  ;;  %v574_v27 = vsel %vm571_vm15, %v573_v24, %v569_v25 }
  0xdc   : > { %v619_v29 = vmul.f32 2.0, %v574_v27 }
  0xdd   : > { %634 = vst [vmem:[%s1229_s25 + $0x60] sm:$0xff] %v618_v26 }
  0xde   : > { %635 = vst [vmem:[%s1229_s25 + $0x68] sm:$0xff] %v619_v29 }
  0xdf   : > { %993 = shalt.err (!%p990_p13)
}
  0xe0   : > { %s1053_s15 = smov 256   ;;  %s1054_s8 = smov 16  }
  0xe1   : > { %804 = dma.vmem_to_hbm [thread:$0]  (%p1121_p9), %s657_s27, 2048, %s659_s28, %s639_s29, %s1053_s15, %s1053_s15, %s1054_s8  }
  0xe2 PF: > { %s673_s18 = sand.u32 1, %s1028_s9   ;;  %p811_p0 = pnand %p772_p12, %p1128_p11 }
  0xe3   : > { %s674_s20 = scalar_lea.sflag [#allocation4], %s673_s18 }
  0xe4   : > { %p812_p1 = pneg %p811_p0 }
  0xe6   : > { %1023 = dma.done.wait (%p812_p1), %s674_s20, 2048  }
  0xe7   : > { %1025 = vsyncadd (%p812_p1), %s674_s20, 4294965248  ;;  %s18_s14 = sadd.s32 1, %s1048_s14   ;;  %s1464_s9 = smov %s1032_s10 }
  0xe8   : > { %p15_p2 = scmp.ge.s32.totalorder %s18_s14, 4   ;;  %s1465_s10 = smov %s1036_s11 }
  0xe9   : > { %s1466_s11 = smov %s1126_s23  ;;  %s1467_s12 = smov %s1044_s13 }
  0xea   : > { %s1468_s13 = smov %s1470_s17  ;;  %17 = sbr.rel (!%p15_p2) target bundleno = 6 (0x6), region = 76 }
  0xef   :  { %680 = vsyncpa [#allocation3], 1 }
  0xf0   :  { %682 = vsyncpa [#allocation3 + $0x1], 1 }
  0xf1   :  { %683 = vsyncpa [#allocation4], 1 }
  0xf2   :  { %685 = vsyncpa [#allocation4 + $0x1], 1 }

</bundles_post_ra>
